<compile_context>
chip_gen: v6e
topology: v6e:2x2x1
jax: 0.10.0
libtpu: 0.0.40
codegen_flags: <defaults>
</compile_context>

<pallas_src>
import jax
import jax.numpy as jnp
import numpy as np
from jax.experimental import pallas as pl
from jax.experimental.pallas import tpu as pltpu


def _clip_embedding_kernel(tok_ref, pos_ref, emb_hbm, out_ref, row_buf, sems):
    # tok_ref : (B*T,)     int32  SMEM  scalar-prefetched token ids
    # pos_ref : (rows, E)  f32    VMEM  position table pre-tiled to the block rows
    # emb_hbm : (V, E)     f32    HBM   token-embedding table (never VMEM-resident)
    # out_ref : (rows, E)  f32    VMEM  output block, rows = bt * T
    # row_buf : (rows, E)  f32    VMEM  gather landing buffer
    # sems    : (rows,)           DMA semaphores (one per row copy)
    rows = row_buf.shape[0]
    base = pl.program_id(0) * rows

    # Issue one row-DMA per token of this tile; all copies are in flight together.
    @pl.loop(0, rows)
    def _issue(r):
        tid = tok_ref[base + r]
        pltpu.make_async_copy(
            emb_hbm.at[pl.ds(tid, 1), :],
            row_buf.at[pl.ds(r, 1), :],
            sems.at[r],
        ).start()

    # Wait for all row gathers (descriptor source only encodes the copy size).
    @pl.loop(0, rows)
    def _wait(r):
        pltpu.make_async_copy(
            emb_hbm.at[pl.ds(0, 1), :],
            row_buf.at[pl.ds(r, 1), :],
            sems.at[r],
        ).wait()

    # Single vreg pass: gathered rows + broadcast position, straight to out.
    out_ref[...] = (row_buf[...] + pos_ref[...]).astype(out_ref.dtype)


def _pick_batch_tile(B, T, E, itemsize, vmem_budget_bytes=8 << 20):
    """Largest batch tile bt (divisor of B) whose VMEM footprint fits a
    conservative budget, with the (8,128)-friendly constraint that the output
    block's row count is a multiple of 8 (or the full B*T extent)."""
    candidates = [d for d in range(1, B + 1)
                  if B % d == 0 and (d == B or (d * T) % 8 == 0)]
    best = None
    for d in candidates:
        # out block (double-buffered) + gather scratch + resident pos tile (x2 safety)
        if 5 * d * T * E * itemsize <= vmem_budget_bytes:
            best = d
    if best is None:
        best = candidates[0]  # smallest layout-legal tile; may exceed soft budget
    return best


def clip_embedding(tokens, token_embedding, position_embedding):
    """ClipEmbedding forward: token_embedding[tokens] + position_embedding.

    tokens:             (B, T) integer ids
    token_embedding:    (V, E) float table (kept in HBM; rows DMA-gathered)
    position_embedding: (T, E) float table (pre-tiled, kept VMEM-resident)
    returns:            (B, T, E) float
    """
    B, T = tokens.shape
    V, E = token_embedding.shape
    assert position_embedding.shape == (T, E)
    out_dtype = token_embedding.dtype

    # The DMA gather has no runtime bounds check matching nn.Embedding's error
    # semantics, so clamp ids into range before they become addresses.
    # TODO(synk): nn.Embedding raises on out-of-range ids; here they are clamped.
    tok_flat = jnp.clip(tokens.reshape(B * T).astype(jnp.int32), 0, V - 1)

    bt = _pick_batch_tile(B, T, E, jnp.dtype(out_dtype).itemsize)
    rows = bt * T

    # Pre-tile the tiny position table so the kernel add needs no reshapes.
    pos_tiled = jnp.tile(position_embedding.astype(out_dtype), (bt, 1))  # (rows, E)

    grid_spec = pltpu.PrefetchScalarGridSpec(
        num_scalar_prefetch=1,                                   # token ids -> SMEM
        grid=(B // bt,),
        in_specs=[
            pl.BlockSpec((rows, E), lambda i, tok: (0, 0)),      # pos tile (resident)
            pl.BlockSpec(memory_space=pl.ANY),                   # emb table stays in HBM
        ],
        out_specs=pl.BlockSpec((rows, E), lambda i, tok: (i, 0)),
        scratch_shapes=[
            pltpu.VMEM((rows, E), out_dtype),                    # gather landing buffer
            pltpu.SemaphoreType.DMA((rows,)),                    # one sem per row DMA
        ],
    )

    out_flat = pl.pallas_call(
        _clip_embedding_kernel,
        out_shape=jax.ShapeDtypeStruct((B * T, E), out_dtype),
        grid_spec=grid_spec,
        compiler_params=pltpu.CompilerParams(
            dimension_semantics=("parallel",)),
    )(tok_flat, pos_tiled, token_embedding)

    return out_flat.reshape(B, T, E)


if __name__ == "__main__":
    # Small shapes consistent with the module: n_vocab=512, n_embd=128, n_token=8, batch=2.
    n_vocab, n_embd, n_token, batch = 512, 128, 8, 2

    key = jax.random.PRNGKey(0)
    k_tok, k_emb, k_pos = jax.random.split(key, 3)

    tokens = jax.random.randint(k_tok, (batch, n_token), 0, n_vocab, dtype=jnp.int32)
    # nn.Embedding weight ~ N(0,1); position_embedding is zeros in __init__, but we
    # give it small deterministic values so the add is actually exercised.
    token_embedding = jax.random.normal(k_emb, (n_vocab, n_embd), dtype=jnp.float32)
    position_embedding = 0.01 * jax.random.normal(
        k_pos, (n_token, n_embd), dtype=jnp.float32)

    out = clip_embedding(tokens, token_embedding, position_embedding)
    out = jax.block_until_ready(out)

    # Pure-JAX reference check.
    ref = token_embedding[tokens] + position_embedding[None, :, :]
    np.testing.assert_allclose(np.asarray(out), np.asarray(ref), rtol=1e-6, atol=1e-6)

    print("KERNEL_OK")
</pallas_src>

<mosaic_0001>
module attributes {stable_mosaic.version = 11 : i64} {
  func.func @_clip_embedding_kernel(%arg0: i32, %arg1: memref<16xi32, #tpu.memory_space<smem>>, %arg2: memref<16x128xf32, #tpu.memory_space<vmem>>, %arg3: memref<512x128xf32, #tpu.memory_space<any>>, %arg4: memref<16x128xf32, #tpu.memory_space<vmem>>, %arg5: memref<16x128xf32, #tpu.memory_space<vmem>>, %arg6: memref<16x!tpu.dma_semaphore, #tpu.memory_space<semaphore_mem>>) attributes {dimension_semantics = [#tpu.dimension_semantics<parallel>], iteration_bounds = array<i64: 1>, scalar_prefetch = 1 : i64, scratch_operands = 2 : i64, tpu.core_type = #tpu.core_type<tc>, window_params = [{pipeline_mode = #tpu.pipeline_mode<synchronous>, transform_indices = @transform_0, window_bounds = array<i64: 16, 128>}, {}, {transform_indices = @transform_2, window_bounds = array<i64: 16, 128>}]} {
    %c16_i32 = arith.constant 16 : i32
    %0 = arith.muli %arg0, %c16_i32 : i32
    %c0_i32 = arith.constant 0 : i32
    %c16_i32_0 = arith.constant 16 : i32
    %1 = arith.addi %c0_i32, %c16_i32_0 : i32
    %c1_i32 = arith.constant 1 : i32
    scf.for %arg7 = %c0_i32 to %1 step %c1_i32  : i32 {
      %c1_i32_11 = arith.constant 1 : i32
      %7 = arith.muli %arg7, %c1_i32_11 : i32
      %c0_i32_12 = arith.constant 0 : i32
      %8 = arith.addi %c0_i32_12, %7 : i32
      %9 = arith.addi %0, %8 : i32
      %10 = arith.index_cast %9 : i32 to index
      %11 = memref.load %arg1[%10] : memref<16xi32, #tpu.memory_space<smem>>
      %c0_i32_13 = arith.constant 0 : i32
      %12 = tpu.memref_slice %arg3[%11, %c0_i32_13] : memref<512x128xf32, #tpu.memory_space<any>> -> memref<1x128xf32, #tpu.memory_space<any>>
      %c0_i32_14 = arith.constant 0 : i32
      %13 = tpu.memref_slice %arg5[%8, %c0_i32_14] : memref<16x128xf32, #tpu.memory_space<vmem>> -> memref<1x128xf32, #tpu.memory_space<vmem>>
      %14 = tpu.memref_slice %arg6[%8] : memref<16x!tpu.dma_semaphore, #tpu.memory_space<semaphore_mem>> -> memref<1x!tpu.dma_semaphore, #tpu.memory_space<semaphore_mem>>
      %15 = tpu.memref_squeeze %14 : memref<1x!tpu.dma_semaphore, #tpu.memory_space<semaphore_mem>> -> memref<!tpu.dma_semaphore, #tpu.memory_space<semaphore_mem>>
      tpu.enqueue_dma source(%12 : memref<1x128xf32, #tpu.memory_space<any>>) target(%13 : memref<1x128xf32, #tpu.memory_space<vmem>>) target_semaphore(%15 : memref<!tpu.dma_semaphore, #tpu.memory_space<semaphore_mem>>)
    }
    %c16_i32_1 = arith.constant 16 : i32
    %c0_i32_2 = arith.constant 0 : i32
    %c16_i32_3 = arith.constant 16 : i32
    %2 = arith.addi %c0_i32_2, %c16_i32_3 : i32
    %c1_i32_4 = arith.constant 1 : i32
    scf.for %arg7 = %c0_i32_2 to %2 step %c1_i32_4  : i32 {
      %c1_i32_11 = arith.constant 1 : i32
      %7 = arith.muli %arg7, %c1_i32_11 : i32
      %c0_i32_12 = arith.constant 0 : i32
      %8 = arith.addi %c0_i32_12, %7 : i32
      %c0_i32_13 = arith.constant 0 : i32
      %c0_i32_14 = arith.constant 0 : i32
      %9 = tpu.memref_slice %arg3[%c0_i32_13, %c0_i32_14] : memref<512x128xf32, #tpu.memory_space<any>> -> memref<1x128xf32, #tpu.memory_space<any>>
      %c0_i32_15 = arith.constant 0 : i32
      %10 = tpu.memref_slice %arg5[%8, %c0_i32_15] : memref<16x128xf32, #tpu.memory_space<vmem>> -> memref<1x128xf32, #tpu.memory_space<vmem>>
      %11 = tpu.memref_slice %arg6[%8] : memref<16x!tpu.dma_semaphore, #tpu.memory_space<semaphore_mem>> -> memref<1x!tpu.dma_semaphore, #tpu.memory_space<semaphore_mem>>
      %12 = tpu.memref_squeeze %11 : memref<1x!tpu.dma_semaphore, #tpu.memory_space<semaphore_mem>> -> memref<!tpu.dma_semaphore, #tpu.memory_space<semaphore_mem>>
      tpu.wait_dma2 semaphore(%12 : memref<!tpu.dma_semaphore, #tpu.memory_space<semaphore_mem>>) src(%9 : memref<1x128xf32, #tpu.memory_space<any>>) dst(%10 : memref<1x128xf32, #tpu.memory_space<vmem>>)
    }
    %c16_i32_5 = arith.constant 16 : i32
    %c0 = arith.constant 0 : index
    %c0_6 = arith.constant 0 : index
    %3 = vector.load %arg5[%c0, %c0_6] : memref<16x128xf32, #tpu.memory_space<vmem>>, vector<16x128xf32>
    %c0_7 = arith.constant 0 : index
    %c0_8 = arith.constant 0 : index
    %4 = vector.load %arg2[%c0_7, %c0_8] : memref<16x128xf32, #tpu.memory_space<vmem>>, vector<16x128xf32>
    %5 = arith.addf %3, %4 : vector<16x128xf32>
    %c0_9 = arith.constant 0 : index
    %c0_10 = arith.constant 0 : index
    %6 = vector.load %arg4[%c0_9, %c0_10] : memref<16x128xf32, #tpu.memory_space<vmem>>, vector<16x128xf32>
    tpu.vector_store %arg4[%c0_9, %c0_10], %5 {strides = array<i32>} : memref<16x128xf32, #tpu.memory_space<vmem>>, vector<16x128xf32>,
    return
  }
  func.func @transform_0(%arg0: i32, %arg1: memref<16xi32, #tpu.memory_space<smem>>) -> (i32, i32) {
    %c0_i32 = arith.constant 0 : i32
    %c0_i32_0 = arith.constant 0 : i32
    %c0_i32_1 = arith.constant 0 : i32
    return %c0_i32, %c0_i32_0 : i32, i32
  }
  func.func @transform_2(%arg0: i32, %arg1: memref<16xi32, #tpu.memory_space<smem>>) -> (i32, i32) {
    %c0_i32 = arith.constant 0 : i32
    %c0_i32_0 = arith.constant 0 : i32
    return %arg0, %c0_i32 : i32, i32
  }
}

</mosaic_0001>

<bundles_post_ra>
// kernel: tpu_custom_call.1
= control target key start
LH: loop header
LB: loop body
LE: loop exit
PB: predicated region body
PF: predicated region fallthrough
CT: control target
= control target key end

     0   :  { %s346_s12 = smov [#allocation5]   ;;  %s407_s0 = inlined_call_operand.hbm [shape: s32[16], index: 0, kind: input, shape index: {}]   ;;  %s408_s1 = inlined_call_operand.hbm [shape: f32[16,128], index: 1, kind: input, shape index: {}]   ;;  %s409_s2 = inlined_call_operand.hbm [shape: f32[512,128], index: 2, kind: input, shape index: {}]   ;;  %s410_s3 = inlined_call_operand.hbm [shape: f32[16,128], index: 3, kind: output, shape index: {}]  }
   0x1   :  { %9 = dma.hbm_to_smem %s407_s0, 16, %s346_s12, [#allocation4] }
   0x2   :  { %330 = dma.done.wait [#allocation4], 16 }
   0x3   :  { %331 = vsyncadd [#allocation4], 4294967280 }
   0x4   :  { %11 = sfence }
   0x5   :  { %12 = vsyncpa [#allocation7], 0 }
   0x6   :  { %13 = vsyncpa [#allocation8], 0  ;;  %s347_s15 = smov [#allocation6]  }
   0x7   :  { %s19_s16 = sshll.u32 %s347_s15, 4  ;;  %s20_s16 = int_to_ptr.vmem [resolvable:$true] %s19_s16 }
   0x8   :  { %s268_s17 = scalar_lea.vmem %s20_s16, 256  ;;  %p273_p1 = scmp.lt.s32.totalorder %s20_s16, %s20_s16 }
   0x9   :  { %p269_p0 = scmp.ne.s32.totalorder %s20_s16, %s268_s17  ;;  %p274_p2 = scmp.lt.s32.totalorder %s268_s17, %s268_s17 }
   0xb   :  { %p275_p3 = por %p274_p2, %p273_p1 }
   0xd   :  { %p276_p4 = pnand %p275_p3, %p269_p0 }
   0xf   :  { %279 = shalt.err (!%p276_p4)
}
  0x10   :  { %s348_s18 = smov 128   ;;  %s349_s19 = smov 8  }
  0x11   :  { %25 = dma.hbm_to_vmem [thread:$0]  %s408_s1, 256, %s20_s16, [#allocation7], %s348_s18, %s348_s18, %s349_s19  }
  0x12   :  { %332 = dma.done.wait [#allocation7], 256  }
  0x13   :  { %333 = vsyncadd [#allocation7], 4294967040  ;;  %s381_s21 = smov 0  }
  0x14 LB: > { %s37_s22 = sld [smem:[#allocation5 + %s340_s21]]  ;;  %s40_s23 = scalar_lea.vmem [#allocation2], %s340_s21  ;;  %s340_s21 = sphi %s381_s21, %s35_s21  }
  0x15   : > { %s49_s24 = sshll.u32 %s40_s23, 4  ;;  %s41_s28 = scalar_lea.sflag [#allocation3], %s340_s21  ;;  %s50_s24 = int_to_ptr.vmem [resolvable:$true] %s49_s24 }
  0x16   : > { %s282_s5 = scalar_lea.hbm %s409_s2, 8192 }
  0x1a   : > { %s214_s25 = sshll.u32 %s37_s22, 4 }
  0x1b   : > { %s39_s1 = scalar_lea.hbm %s409_s2, %s214_s25 }
  0x1c   : > { %s280_s29 = scalar_lea.hbm %s39_s1, 16  ;;  %p283_p6 = scmp.lt.s32.totalorder %s39_s1, %s409_s2 }
  0x1d   : > { %p281_p5 = scmp.ne.s32.totalorder %s39_s1, %s280_s29  ;;  %p284_p7 = scmp.lt.s32.totalorder %s282_s5, %s280_s29 }
  0x1f   : > { %p285_p8 = por %p284_p7, %p283_p6 }
  0x21   : > { %p286_p9 = pnand %p285_p8, %p281_p5 }
  0x23   : > { %289 = shalt.err (!%p286_p9)  }
  0x24   : > { %s290_s8 = scalar_lea.vmem %s50_s24, 16  ;;  %s350_s9 = smov [#allocation2]  }
  0x25   : > { %p291_p10 = scmp.ne.s32.totalorder %s50_s24, %s290_s8  ;;  %s292_s10 = sshll.u32 %s350_s9, 4  ;;  %s293_s10 = int_to_ptr.vmem [resolvable:$false] %s292_s10 }
  0x26   : > { %s294_s11 = scalar_lea.vmem %s293_s10, 256  ;;  %p295_p11 = scmp.lt.s32.totalorder %s50_s24, %s293_s10 }
  0x27   : > { %p296_p12 = scmp.lt.s32.totalorder %s294_s11, %s290_s8 }
  0x29   : > { %p297_p13 = por %p296_p12, %p295_p11 }
  0x2b   : > { %p298_p0 = pnand %p297_p13, %p291_p10 }
  0x2d   : > { %301 = shalt.err (!%p298_p0)  }
  0x2e   : > { %52 = dma.hbm_to_vmem [thread:$0]  %s39_s1, 16, %s50_s24, %s41_s28 }
  0x2f   : > { %s35_s21 = sadd.s32 1, %s340_s21  }
  0x30   : > { %p32_p1 = scmp.ge.s32.totalorder %s35_s21, 16  }
  0x31   :  { %s342_s12 = smov (%p32_p1), 0  }
  0x32   :  { %34 = sbr.rel (!%p32_p1) target bundleno = 20 (0x14), region = 65 }
  0x37 LB: > { %s59_s13 = scalar_lea.sflag [#allocation3], %s344_s12  ;;  %s344_s12 = sphi %s342_s12, %s58_s12  }
  0x38   : > { %334 = dma.done.wait %s59_s13, 16 }
  0x39   : > { %335 = vsyncadd %s59_s13, 4294967280  ;;  %s58_s12 = sadd.s32 1, %s344_s12  }
  0x3a   : > { %p55_p2 = scmp.ge.s32.totalorder %s58_s12, 16  }
  0x3b   :  { %v63_v0 = vld [vmem:[#allocation2] sm:$0xff] (%p55_p2)  ;;  %v65_v1 = vld [vmem:[#allocation6] sm:$0xff] (%p55_p2)  ;;  %v64_v2 = vld [vmem:[#allocation2 + $0x8] sm:$0xff] (%p55_p2)  ;;  %s351_s14 = smov (%p55_p2), [#allocation9]  }
  0x3c   :  { %57 = sbr.rel (!%p55_p2) target bundleno = 55 (0x37), region = 76  ;;  %v67_v3 = vadd.f32 (%p55_p2), %v65_v1, %v63_v0  ;;  %v66_v4 = vld [vmem:[#allocation6 + $0x8] sm:$0xff] (%p55_p2)  ;;  %s76_s15 = sshll.u32 (%p55_p2), %s351_s14, 4  ;;  %s77_s15 = int_to_ptr.vmem [resolvable:$true] %s76_s15 }
  0x3d   :  { %v68_v5 = vadd.f32 (%p55_p2), %v66_v4, %v64_v2  ;;  %s302_s2 = scalar_lea.vmem (%p55_p2), %s77_s15, 256  ;;  %p307_p4 = scmp.lt.s32.totalorder (%p55_p2), %s77_s15, %s77_s15 }
  0x3e   :  { %69 = vst [vmem:[#allocation9] sm:$0xff] (%p55_p2), %v67_v3  ;;  %p303_p3 = scmp.ne.s32.totalorder (%p55_p2), %s77_s15, %s302_s2  ;;  %p308_p5 = scmp.lt.s32.totalorder (%p55_p2), %s302_s2, %s302_s2 }
  0x3f   :  { %70 = vst [vmem:[#allocation9 + $0x8] sm:$0xff] (%p55_p2), %v68_v5 }
  0x40   :  { %p309_p6 = por (%p55_p2), %p308_p5, %p307_p4 }
  0x42   :  { %p310_p7 = pnand %p309_p6, %p303_p3 }
  0x44   :  { %313 = shalt.err (!%p310_p7)
}
  0x45   :  { %82 = dma.vmem_to_hbm [thread:$0]  %s77_s15, 256, %s410_s3, [#allocation8], %s348_s18, %s348_s18, %s349_s19  }
  0x46   :  { %336 = dma.done.wait [#allocation8], 256  }
  0x47   :  { %337 = vsyncadd [#allocation8], 4294967040 }
  0x48   :  { %86 = vsyncpa [#allocation7], 1 }
  0x49   :  { %87 = vsyncpa [#allocation8], 1 }
  0x4a   :  { %88 = vsyncmov [#allocation3] }
  0x4d   :  { %s89_s0 = vpop.sfrf %88 }
  0x4e   :  { %p215_p8 = scmp.ne.s32.totalorder %s89_s0, 0 }
  0x50   :  { %93 = shalt.err (%p215_p8)  }
  0x51   :  { %95 = vsyncmov [#allocation3 + $0x1] }
  0x54   :  { %s96_s20 = vpop.sfrf %95 }
  0x55   :  { %p216_p9 = scmp.ne.s32.totalorder %s96_s20, 0 }
  0x57   :  { %100 = shalt.err (%p216_p9)  }
  0x58   :  { %102 = vsyncmov [#allocation3 + $0x2] }
  0x5b   :  { %s103_s21 = vpop.sfrf %102 }
  0x5c   :  { %p217_p10 = scmp.ne.s32.totalorder %s103_s21, 0 }
  0x5e   :  { %107 = shalt.err (%p217_p10)  }
  0x5f   :  { %109 = vsyncmov [#allocation3 + $0x3] }
  0x62   :  { %s110_s22 = vpop.sfrf %109 }
  0x63   :  { %p218_p11 = scmp.ne.s32.totalorder %s110_s22, 0 }
  0x65   :  { %114 = shalt.err (%p218_p11)  }
  0x66   :  { %116 = vsyncmov [#allocation3 + $0x4] }
  0x69   :  { %s117_s3 = vpop.sfrf %116 }
  0x6a   :  { %p219_p12 = scmp.ne.s32.totalorder %s117_s3, 0 }
  0x6c   :  { %121 = shalt.err (%p219_p12)  }
  0x6d   :  { %123 = vsyncmov [#allocation3 + $0x5] }
  0x70   :  { %s124_s18 = vpop.sfrf %123 }
  0x71   :  { %p220_p13 = scmp.ne.s32.totalorder %s124_s18, 0 }
  0x73   :  { %128 = shalt.err (%p220_p13)  }
  0x74   :  { %130 = vsyncmov [#allocation3 + $0x6] }
  0x77   :  { %s131_s19 = vpop.sfrf %130 }
  0x78   :  { %p221_p0 = scmp.ne.s32.totalorder %s131_s19, 0 }
  0x7a   :  { %135 = shalt.err (%p221_p0)  }
  0x7b   :  { %137 = vsyncmov [#allocation3 + $0x7] }
  0x7e   :  { %s138_s23 = vpop.sfrf %137 }
  0x7f   :  { %p222_p1 = scmp.ne.s32.totalorder %s138_s23, 0 }
  0x81   :  { %142 = shalt.err (%p222_p1)  }
  0x82   :  { %144 = vsyncmov [#allocation3 + $0x8] }
  0x85   :  { %s145_s24 = vpop.sfrf %144 }
  0x86   :  { %p223_p2 = scmp.ne.s32.totalorder %s145_s24, 0 }
  0x88   :  { %149 = shalt.err (%p223_p2)  }
  0x89   :  { %151 = vsyncmov [#allocation3 + $0x9] }
  0x8c   :  { %s152_s25 = vpop.sfrf %151 }
  0x8d   :  { %p224_p3 = scmp.ne.s32.totalorder %s152_s25, 0 }
  0x8f   :  { %156 = shalt.err (%p224_p3)  }
  0x90   :  { %158 = vsyncmov [#allocation3 + $0xa] }
  0x93   :  { %s159_s26 = vpop.sfrf %158 }
  0x94   :  { %p225_p4 = scmp.ne.s32.totalorder %s159_s26, 0 }
  0x96   :  { %163 = shalt.err (%p225_p4)  }
  0x97   :  { %165 = vsyncmov [#allocation3 + $0xb] }
  0x9a   :  { %s166_s27 = vpop.sfrf %165 }
  0x9b   :  { %p226_p5 = scmp.ne.s32.totalorder %s166_s27, 0 }
  0x9d   :  { %170 = shalt.err (%p226_p5)  }
  0x9e   :  { %172 = vsyncmov [#allocation3 + $0xc] }
  0xa1   :  { %s173_s1 = vpop.sfrf %172 }
  0xa2   :  { %p227_p6 = scmp.ne.s32.totalorder %s173_s1, 0 }
  0xa4   :  { %177 = shalt.err (%p227_p6)  }
  0xa5   :  { %179 = vsyncmov [#allocation3 + $0xd] }
  0xa8   :  { %s180_s28 = vpop.sfrf %179 }
  0xa9   :  { %p228_p7 = scmp.ne.s32.totalorder %s180_s28, 0 }
  0xab   :  { %184 = shalt.err (%p228_p7)  }
  0xac   :  { %186 = vsyncmov [#allocation3 + $0xe] }
  0xaf   :  { %s187_s29 = vpop.sfrf %186 }
  0xb0   :  { %p229_p8 = scmp.ne.s32.totalorder %s187_s29, 0 }
  0xb2   :  { %191 = shalt.err (%p229_p8)  }
  0xb3   :  { %193 = vsyncmov [#allocation3 + $0xf] }
  0xb6   :  { %s194_s30 = vpop.sfrf %193 }
  0xb7   :  { %p230_p9 = scmp.ne.s32.totalorder %s194_s30, 0 }
  0xb9   :  { %198 = shalt.err (%p230_p9)  }

</bundles_post_ra>
